<compile_context>
chip_gen: v6e
topology: v6e:2x2x1
jax: 0.10.0
libtpu: 0.0.40
codegen_flags: <defaults>
</compile_context>

<pallas_src>
import functools

import jax
import jax.numpy as jnp
import numpy as np
from jax.experimental import pallas as pl
from jax.experimental.pallas import tpu as pltpu

_A = -0.75  # PyTorch bicubic convolution constant


def _cubic1(t):
    return ((_A + 2.0) * t - (_A + 3.0)) * t * t + 1.0


def _cubic2(t):
    return ((_A * t - 5.0 * _A) * t + 8.0 * _A) * t - 4.0 * _A


def _cubic_weights(t):
    # 4 taps at offsets (-1, 0, +1, +2) relative to floor(coord)
    return (_cubic2(t + 1.0), _cubic1(t), _cubic1(1.0 - t), _cubic2(2.0 - t))


def _interp_kernel(pos_ref, x_ref, out_ref, acc_ref, wx_ref, ycoef_ref, *,
                   Hn, Wn, Himg, Wimg, rows_per_tile):
    """Grid = (B, N_tiles, HW_row_chunks); the row-chunk axis (k) is the reduction.

    pos_ref  : [1, 2, tn]              (x, y) pixel coords, lane-dense, f32
    x_ref    : [1, C, rows, Wimg]      row chunk of the feature map (mxu dtype)
    out_ref  : [1, C, tn]
    acc_ref  : [C, tn]   f32 scratch accumulator
    wx_ref   : [Wimg, tn] scratch, hoisted x-direction one-hot weights (mxu dtype)
    ycoef_ref: [8, tn]   f32 scratch, rows 0..3 = y cubic taps, row 4 = floor(iy)
    """
    k = pl.program_id(2)
    rows = rows_per_tile
    tn = pos_ref.shape[2]

    @pl.when(k == 0)
    def _init():
        acc_ref[...] = jnp.zeros_like(acc_ref)

        pos = pos_ref[0].astype(jnp.float32)            # [2, tn]
        px = pos[0:1, :]                                # x
        py = pos[1:2, :]                                # y

        # normgrid: normalize to [-1, 1] with the caller-supplied (H, W).
        # NOTE: guarded against H==1 / W==1 divide-by-zero (PyTorch would give inf there).
        gx = 2.0 * px / max(Wn - 1.0, 1.0) - 1.0
        gy = 2.0 * py / max(Hn - 1.0, 1.0) - 1.0
        # grid_sample unnormalization (align_corners=False) with the feature-map extent.
        ix = ((gx + 1.0) * Wimg - 1.0) * 0.5
        iy = ((gy + 1.0) * Himg - 1.0) * 0.5

        ix0 = jnp.floor(ix)
        iy0 = jnp.floor(iy)
        wxs = _cubic_weights(ix - ix0)                  # 4 x [1, tn]
        wys = _cubic_weights(iy - iy0)                  # 4 x [1, tn]
        ix0i = ix0.astype(jnp.int32)

        # Hoisted x-direction one-hot weights (zeros padding for OOB taps).
        iota_x = jax.lax.broadcasted_iota(jnp.int32, (Wimg, tn), 0)
        wx = jnp.zeros((Wimg, tn), jnp.float32)
        for i in range(4):
            xi = ix0i + (i - 1)                          # [1, tn]
            vx = (xi >= 0) & (xi < Wimg)
            wx = wx + jnp.where((iota_x == xi) & vx, wxs[i], 0.0)
        wx_ref[...] = wx.astype(wx_ref.dtype)

        # Hoisted y-direction tap coefficients.
        ycoef_ref[0:1, :] = wys[0]
        ycoef_ref[1:2, :] = wys[1]
        ycoef_ref[2:3, :] = wys[2]
        ycoef_ref[3:4, :] = wys[3]
        ycoef_ref[4:5, :] = iy0

    # --- per reduction step ------------------------------------------------
    yc = ycoef_ref[...]                                  # [8, tn] f32
    iy0i = yc[4:5, :].astype(jnp.int32)                  # [1, tn]
    row_base = k * rows

    # y-direction one-hot weights for this row chunk (f32 for accuracy).
    iota_y = jax.lax.broadcasted_iota(jnp.int32, (rows, tn), 0) + row_base
    wy = jnp.zeros((rows, tn), jnp.float32)
    for j in range(4):
        yj = iy0i + (j - 1)                              # [1, tn]
        vy = (yj >= 0) & (yj < Himg)
        wy = wy + jnp.where((iota_y == yj) & vy, yc[j:j + 1, :], 0.0)

    feat = x_ref[0]                                      # [C, rows, Wimg], mxu dtype
    C = feat.shape[0]

    # Stage 1 (MXU): contract image columns against the hoisted x weights.
    g = jnp.dot(feat.reshape(C * rows, Wimg), wx_ref[...],
                preferred_element_type=jnp.float32)      # [C*rows, tn] f32
    # Stage 2 (VPU + XLU): per-point y-weighted reduction over the row axis.
    acc_ref[...] += (g.reshape(C, rows, tn) * wy[None, :, :]).sum(axis=1)

    @pl.when(k == pl.num_programs(2) - 1)
    def _finalize():
        out_ref[0] = acc_ref[...].astype(out_ref.dtype)


def _round_up(v, m):
    return ((v + m - 1) // m) * m


def _vmem_capacity_bytes():
    try:
        info = pltpu.get_tpu_info()
        for attr in ("vmem_capacity_bytes", "vmem_size_bytes", "vmem_bytes"):
            v = getattr(info, attr, None)
            if v:
                return int(v)
    except Exception:
        pass
    return 64 << 20  # conservative fallback: v7x per-TensorCore VMEM


def _choose_tiles(Himg, Wimg, C, N, x_bytes, budget, sublane_mult, max_tile_n):
    """Pick (rows_per_tile, tile_n, n_padded) under the per-step VMEM budget."""
    # Lane-dense point tiling: prefer a single N tile (NT == 1) so the feature map is
    # streamed from HBM exactly once; split only for very large N.
    n_pad = _round_up(N, 128)
    tile_n = min(n_pad, max(128, _round_up(max_tile_n, 128)))
    n_pad = _round_up(n_pad, tile_n)

    def vmem_est(rows):
        est = 2 * C * rows * Wimg * x_bytes        # double-buffered feature chunk
        est += 2 * 2 * tile_n * 4                  # pos block (double-buffered)
        est += 2 * C * tile_n * 4                  # output block (double-buffered)
        est += C * tile_n * 4                      # f32 accumulator scratch
        est += Wimg * tile_n * x_bytes             # hoisted wx scratch
        est += 8 * tile_n * 4                      # hoisted y-coefficient scratch
        est += 2 * C * rows * tile_n * 4           # stage-1 result + wy temporaries (f32)
        return est

    # rows_per_tile must divide Himg; keeping it a sublane multiple makes the in-kernel
    # [C, rows, Wimg] <-> [C*rows, Wimg] reshapes layout-free.
    feasible = [r for r in range(Himg, 0, -1)
                if Himg % r == 0 and (r % sublane_mult == 0 or r == Himg)]
    for r in feasible:
        if vmem_est(r) <= budget:
            return r, tile_n, n_pad
    return feasible[-1], tile_n, n_pad


def interpolate_sparse2d(x, pos, H, W, *, mxu_dtype=None, max_tile_n=4096,
                         vmem_budget=None):
    """Pallas equivalent of InterpolateSparse2d.forward.

    x  : [B, C, Himg, Wimg]  feature tensor (NCHW)
    pos: [B, N, 2]           (x, y) positions in the original H x W resolution
    H,W: ints used for the [-1, 1] normalization
    Returns [B, N, C] (same dtype as x).
    """
    B, C, Himg, Wimg = x.shape
    N = pos.shape[1]

    if mxu_dtype is None:
        mxu_dtype = jnp.bfloat16 if x.dtype == jnp.bfloat16 else jnp.float32
    mxu_dtype = jnp.dtype(mxu_dtype)

    # Cast features once in HBM (halves the dominant DMA stream when bf16).
    x_mxu = x if x.dtype == mxu_dtype else x.astype(mxu_dtype)
    # Coordinates stay f32 regardless of feature dtype (bf16 pos would corrupt floor/frac).
    pos_t = jnp.transpose(pos.astype(jnp.float32), (0, 2, 1))   # [B, 2, N], lane-dense

    cap = _vmem_capacity_bytes()
    budget = vmem_budget if vmem_budget is not None else (cap * 9) // 16
    vmem_limit = int(max(32 << 20, min((cap * 3) // 4, 100 << 20)))

    sublane_mult = 16 if mxu_dtype == jnp.bfloat16 else 8
    rows_per_tile, tile_n, n_pad = _choose_tiles(
        Himg, Wimg, C, N, mxu_dtype.itemsize, budget, sublane_mult, max_tile_n)

    if n_pad != N:  # pad points to a lane-dense multiple (truncated after the call)
        pos_t = jnp.pad(pos_t, ((0, 0), (0, 0), (0, n_pad - N)))

    KT = Himg // rows_per_tile
    NT = n_pad // tile_n

    kernel = functools.partial(
        _interp_kernel, Hn=float(H), Wn=float(W), Himg=Himg, Wimg=Wimg,
        rows_per_tile=rows_per_tile)

    out_cn = pl.pallas_call(
        kernel,
        out_shape=jax.ShapeDtypeStruct((B, C, n_pad), x.dtype),
        grid=(B, NT, KT),
        in_specs=[
            pl.BlockSpec((1, 2, tile_n), lambda b, nt, k: (b, 0, nt)),
            pl.BlockSpec((1, C, rows_per_tile, Wimg), lambda b, nt, k: (b, 0, k, 0)),
        ],
        out_specs=pl.BlockSpec((1, C, tile_n), lambda b, nt, k: (b, 0, nt)),
        scratch_shapes=[
            pltpu.VMEM((C, tile_n), jnp.float32),      # accumulator
            pltpu.VMEM((Wimg, tile_n), mxu_dtype),     # hoisted wx one-hot weights
            pltpu.VMEM((8, tile_n), jnp.float32),      # hoisted y tap coefficients
        ],
        compiler_params=pltpu.CompilerParams(
            dimension_semantics=("parallel", "parallel", "arbitrary"),
            vmem_limit_bytes=vmem_limit,
        ),
    )(pos_t, x_mxu)

    # Truncate padded points and match PyTorch's [B, N, C] output layout.
    return jnp.transpose(out_cn[:, :, :N], (0, 2, 1))


def _reference(x, pos, H, W):
    """Pure-JAX reference (PyTorch grid_sample bicubic, zeros padding, align_corners=False)."""
    B, C, Himg, Wimg = x.shape
    px = pos[..., 0].astype(jnp.float32)
    py = pos[..., 1].astype(jnp.float32)
    gx = 2.0 * px / (W - 1.0) - 1.0
    gy = 2.0 * py / (H - 1.0) - 1.0
    ix = ((gx + 1.0) * Wimg - 1.0) * 0.5
    iy = ((gy + 1.0) * Himg - 1.0) * 0.5
    ix0 = jnp.floor(ix)
    iy0 = jnp.floor(iy)
    wxs = _cubic_weights(ix - ix0)
    wys = _cubic_weights(iy - iy0)
    ix0i = ix0.astype(jnp.int32)
    iy0i = iy0.astype(jnp.int32)
    bidx = jnp.arange(B)[:, None]
    out = jnp.zeros((B, pos.shape[1], C), jnp.float32)
    for j in range(4):
        yj = iy0i + (j - 1)
        vy = (yj >= 0) & (yj < Himg)
        yc = jnp.clip(yj, 0, Himg - 1)
        for i in range(4):
            xi = ix0i + (i - 1)
            vx = (xi >= 0) & (xi < Wimg)
            xc = jnp.clip(xi, 0, Wimg - 1)
            vals = x[bidx, :, yc, xc]                       # [B, N, C]
            w = wys[j] * wxs[i] * vy.astype(jnp.float32) * vx.astype(jnp.float32)
            out = out + w[..., None] * vals
    return out.astype(x.dtype)


if __name__ == "__main__":
    key = jax.random.PRNGKey(0)
    kx, kp, kx2, kp2 = jax.random.split(key, 4)

    # --- Test 1: small shapes, single HW chunk / single N tile, f32 MXU path ---
    B, C, Himg, Wimg, N = 2, 4, 16, 16, 8
    H, W = Himg, Wimg
    x = jax.random.normal(kx, (B, C, Himg, Wimg), dtype=jnp.float32)
    # positions near borders exercise the zero-padding of out-of-bound bicubic taps
    pos = jax.random.uniform(kp, (B, N, 2), dtype=jnp.float32, minval=0.0, maxval=W - 1.0)

    out = jax.block_until_ready(interpolate_sparse2d(x, pos, H, W))
    ref = jax.block_until_ready(_reference(x, pos, H, W))
    np.testing.assert_allclose(np.asarray(out), np.asarray(ref), rtol=1e-4, atol=1e-5)

    # --- Test 2: forces the HW-chunk reduction axis (KT>1), N tiling (NT>1) and N padding ---
    B2, C2, Hi2, Wi2, N2 = 1, 8, 32, 32, 200
    x2 = jax.random.normal(kx2, (B2, C2, Hi2, Wi2), dtype=jnp.float32)
    pos2 = jax.random.uniform(kp2, (B2, N2, 2), dtype=jnp.float32,
                              minval=0.0, maxval=Wi2 - 1.0)
    out2 = jax.block_until_ready(
        interpolate_sparse2d(x2, pos2, Hi2, Wi2, max_tile_n=128, vmem_budget=300 * 1024))
    ref2 = jax.block_until_ready(_reference(x2, pos2, Hi2, Wi2))
    np.testing.assert_allclose(np.asarray(out2), np.asarray(ref2), rtol=1e-4, atol=1e-5)

    # --- Test 3: bf16 MXU operands (v6e/v7x fast path), f32 y-weights + accumulation ---
    out3 = jax.block_until_ready(
        interpolate_sparse2d(x, pos, H, W, mxu_dtype=jnp.bfloat16))
    np.testing.assert_allclose(np.asarray(out3), np.asarray(ref), rtol=5e-2, atol=1e-1)

    print("KERNEL_OK")
</pallas_src>

<mosaic_0001>
module attributes {stable_mosaic.version = 11 : i64} {
  func.func @_interp_kernel(%arg0: i32, %arg1: i32, %arg2: i32, %arg3: memref<1x2x128xf32, #tpu.memory_space<vmem>>, %arg4: memref<1x4x16x16xf32, #tpu.memory_space<vmem>>, %arg5: memref<1x4x128xf32, #tpu.memory_space<vmem>>, %arg6: memref<4x128xf32, #tpu.memory_space<vmem>>, %arg7: memref<16x128xf32, #tpu.memory_space<vmem>>, %arg8: memref<8x128xf32, #tpu.memory_space<vmem>>) attributes {dimension_semantics = [#tpu.dimension_semantics<parallel>, #tpu.dimension_semantics<parallel>, #tpu.dimension_semantics<arbitrary>], iteration_bounds = array<i64: 2, 1, 1>, scalar_prefetch = 0 : i64, scratch_operands = 3 : i64, tpu.core_type = #tpu.core_type<tc>, window_params = [{transform_indices = @transform_0, window_bounds = array<i64: 1, 2, 128>}, {transform_indices = @transform_1, window_bounds = array<i64: 1, 4, 16, 16>}, {transform_indices = @transform_2, window_bounds = array<i64: 1, 4, 128>}]} {
    %c0_i32 = arith.constant 0 : i32
    %0 = arith.cmpi eq, %arg2, %c0_i32 : i32
    %1 = arith.extui %0 : i1 to i32
    %c0_i32_0 = arith.constant 0 : i32
    %2 = arith.cmpi ne, %1, %c0_i32_0 : i32
    scf.if %2 {
      %cst_29 = arith.constant 0.000000e+00 : f32
      %95 = vector.broadcast %cst_29 : f32 to vector<4x128xf32>
      %c0_30 = arith.constant 0 : index
      %c0_31 = arith.constant 0 : index
      %96 = vector.load %arg6[%c0_30, %c0_31] : memref<4x128xf32, #tpu.memory_space<vmem>>, vector<4x128xf32>
      tpu.vector_store %arg6[%c0_30, %c0_31], %95 {strides = array<i32>} : memref<4x128xf32, #tpu.memory_space<vmem>>, vector<4x128xf32>,
      %c0_32 = arith.constant 0 : index
      %c0_33 = arith.constant 0 : index
      %c0_34 = arith.constant 0 : index
      %97 = vector.load %arg3[%c0_32, %c0_33, %c0_34] : memref<1x2x128xf32, #tpu.memory_space<vmem>>, vector<1x2x128xf32>
      %98 = vector.shape_cast %97 : vector<1x2x128xf32> to vector<2x128xf32>
      %99 = vector.extract_strided_slice %98 {offsets = [0, 0], sizes = [1, 128], strides = [1, 1]} : vector<2x128xf32> to vector<1x128xf32>
      %100 = vector.extract_strided_slice %98 {offsets = [1, 0], sizes = [1, 128], strides = [1, 1]} : vector<2x128xf32> to vector<1x128xf32>
      %cst_35 = arith.constant 2.000000e+00 : f32
      %101 = vector.broadcast %cst_35 : f32 to vector<1x128xf32>
      %102 = arith.mulf %101, %99 : vector<1x128xf32>
      %cst_36 = arith.constant 1.500000e+01 : f32
      %103 = vector.broadcast %cst_36 : f32 to vector<1x128xf32>
      %104 = arith.divf %102, %103 : vector<1x128xf32>
      %cst_37 = arith.constant 1.000000e+00 : f32
      %105 = vector.broadcast %cst_37 : f32 to vector<1x128xf32>
      %106 = arith.subf %104, %105 : vector<1x128xf32>
      %cst_38 = arith.constant 2.000000e+00 : f32
      %107 = vector.broadcast %cst_38 : f32 to vector<1x128xf32>
      %108 = arith.mulf %107, %100 : vector<1x128xf32>
      %cst_39 = arith.constant 1.500000e+01 : f32
      %109 = vector.broadcast %cst_39 : f32 to vector<1x128xf32>
      %110 = arith.divf %108, %109 : vector<1x128xf32>
      %cst_40 = arith.constant 1.000000e+00 : f32
      %111 = vector.broadcast %cst_40 : f32 to vector<1x128xf32>
      %112 = arith.subf %110, %111 : vector<1x128xf32>
      %cst_41 = arith.constant 1.000000e+00 : f32
      %113 = vector.broadcast %cst_41 : f32 to vector<1x128xf32>
      %114 = arith.addf %106, %113 : vector<1x128xf32>
      %cst_42 = arith.constant 1.600000e+01 : f32
      %115 = vector.broadcast %cst_42 : f32 to vector<1x128xf32>
      %116 = arith.mulf %114, %115 : vector<1x128xf32>
      %cst_43 = arith.constant 1.000000e+00 : f32
      %117 = vector.broadcast %cst_43 : f32 to vector<1x128xf32>
      %118 = arith.subf %116, %117 : vector<1x128xf32>
      %cst_44 = arith.constant 5.000000e-01 : f32
      %119 = vector.broadcast %cst_44 : f32 to vector<1x128xf32>
      %120 = arith.mulf %118, %119 : vector<1x128xf32>
      %cst_45 = arith.constant 1.000000e+00 : f32
      %121 = vector.broadcast %cst_45 : f32 to vector<1x128xf32>
      %122 = arith.addf %112, %121 : vector<1x128xf32>
      %cst_46 = arith.constant 1.600000e+01 : f32
      %123 = vector.broadcast %cst_46 : f32 to vector<1x128xf32>
      %124 = arith.mulf %122, %123 : vector<1x128xf32>
      %cst_47 = arith.constant 1.000000e+00 : f32
      %125 = vector.broadcast %cst_47 : f32 to vector<1x128xf32>
      %126 = arith.subf %124, %125 : vector<1x128xf32>
      %cst_48 = arith.constant 5.000000e-01 : f32
      %127 = vector.broadcast %cst_48 : f32 to vector<1x128xf32>
      %128 = arith.mulf %126, %127 : vector<1x128xf32>
      %129 = math.floor %120 : vector<1x128xf32>
      %130 = math.floor %128 : vector<1x128xf32>
      %131 = arith.subf %120, %129 : vector<1x128xf32>
      %cst_49 = arith.constant 1.000000e+00 : f32
      %132 = vector.broadcast %cst_49 : f32 to vector<1x128xf32>
      %133 = arith.addf %131, %132 : vector<1x128xf32>
      %cst_50 = arith.constant -7.500000e-01 : f32
      %134 = vector.broadcast %cst_50 : f32 to vector<1x128xf32>
      %135 = arith.mulf %134, %133 : vector<1x128xf32>
      %cst_51 = arith.constant -3.750000e+00 : f32
      %136 = vector.broadcast %cst_51 : f32 to vector<1x128xf32>
      %137 = arith.subf %135, %136 : vector<1x128xf32>
      %138 = arith.mulf %137, %133 : vector<1x128xf32>
      %cst_52 = arith.constant -6.000000e+00 : f32
      %139 = vector.broadcast %cst_52 : f32 to vector<1x128xf32>
      %140 = arith.addf %138, %139 : vector<1x128xf32>
      %141 = arith.mulf %140, %133 : vector<1x128xf32>
      %cst_53 = arith.constant -3.000000e+00 : f32
      %142 = vector.broadcast %cst_53 : f32 to vector<1x128xf32>
      %143 = arith.subf %141, %142 : vector<1x128xf32>
      %cst_54 = arith.constant 1.250000e+00 : f32
      %144 = vector.broadcast %cst_54 : f32 to vector<1x128xf32>
      %145 = arith.mulf %144, %131 : vector<1x128xf32>
      %cst_55 = arith.constant 2.250000e+00 : f32
      %146 = vector.broadcast %cst_55 : f32 to vector<1x128xf32>
      %147 = arith.subf %145, %146 : vector<1x128xf32>
      %148 = arith.mulf %147, %131 : vector<1x128xf32>
      %149 = arith.mulf %148, %131 : vector<1x128xf32>
      %cst_56 = arith.constant 1.000000e+00 : f32
      %150 = vector.broadcast %cst_56 : f32 to vector<1x128xf32>
      %151 = arith.addf %149, %150 : vector<1x128xf32>
      %cst_57 = arith.constant 1.000000e+00 : f32
      %152 = vector.broadcast %cst_57 : f32 to vector<1x128xf32>
      %153 = arith.subf %152, %131 : vector<1x128xf32>
      %cst_58 = arith.constant 1.250000e+00 : f32
      %154 = vector.broadcast %cst_58 : f32 to vector<1x128xf32>
      %155 = arith.mulf %154, %153 : vector<1x128xf32>
      %cst_59 = arith.constant 2.250000e+00 : f32
      %156 = vector.broadcast %cst_59 : f32 to vector<1x128xf32>
      %157 = arith.subf %155, %156 : vector<1x128xf32>
      %158 = arith.mulf %157, %153 : vector<1x128xf32>
      %159 = arith.mulf %158, %153 : vector<1x128xf32>
      %cst_60 = arith.constant 1.000000e+00 : f32
      %160 = vector.broadcast %cst_60 : f32 to vector<1x128xf32>
      %161 = arith.addf %159, %160 : vector<1x128xf32>
      %cst_61 = arith.constant 2.000000e+00 : f32
      %162 = vector.broadcast %cst_61 : f32 to vector<1x128xf32>
      %163 = arith.subf %162, %131 : vector<1x128xf32>
      %cst_62 = arith.constant -7.500000e-01 : f32
      %164 = vector.broadcast %cst_62 : f32 to vector<1x128xf32>
      %165 = arith.mulf %164, %163 : vector<1x128xf32>
      %cst_63 = arith.constant -3.750000e+00 : f32
      %166 = vector.broadcast %cst_63 : f32 to vector<1x128xf32>
      %167 = arith.subf %165, %166 : vector<1x128xf32>
      %168 = arith.mulf %167, %163 : vector<1x128xf32>
      %cst_64 = arith.constant -6.000000e+00 : f32
      %169 = vector.broadcast %cst_64 : f32 to vector<1x128xf32>
      %170 = arith.addf %168, %169 : vector<1x128xf32>
      %171 = arith.mulf %170, %163 : vector<1x128xf32>
      %cst_65 = arith.constant -3.000000e+00 : f32
      %172 = vector.broadcast %cst_65 : f32 to vector<1x128xf32>
      %173 = arith.subf %171, %172 : vector<1x128xf32>
      %174 = arith.subf %128, %130 : vector<1x128xf32>
      %cst_66 = arith.constant 1.000000e+00 : f32
      %175 = vector.broadcast %cst_66 : f32 to vector<1x128xf32>
      %176 = arith.addf %174, %175 : vector<1x128xf32>
      %cst_67 = arith.constant -7.500000e-01 : f32
      %177 = vector.broadcast %cst_67 : f32 to vector<1x128xf32>
      %178 = arith.mulf %177, %176 : vector<1x128xf32>
      %cst_68 = arith.constant -3.750000e+00 : f32
      %179 = vector.broadcast %cst_68 : f32 to vector<1x128xf32>
      %180 = arith.subf %178, %179 : vector<1x128xf32>
      %181 = arith.mulf %180, %176 : vector<1x128xf32>
      %cst_69 = arith.constant -6.000000e+00 : f32
      %182 = vector.broadcast %cst_69 : f32 to vector<1x128xf32>
      %183 = arith.addf %181, %182 : vector<1x128xf32>
      %184 = arith.mulf %183, %176 : vector<1x128xf32>
      %cst_70 = arith.constant -3.000000e+00 : f32
      %185 = vector.broadcast %cst_70 : f32 to vector<1x128xf32>
      %186 = arith.subf %184, %185 : vector<1x128xf32>
      %cst_71 = arith.constant 1.250000e+00 : f32
      %187 = vector.broadcast %cst_71 : f32 to vector<1x128xf32>
      %188 = arith.mulf %187, %174 : vector<1x128xf32>
      %cst_72 = arith.constant 2.250000e+00 : f32
      %189 = vector.broadcast %cst_72 : f32 to vector<1x128xf32>
      %190 = arith.subf %188, %189 : vector<1x128xf32>
      %191 = arith.mulf %190, %174 : vector<1x128xf32>
      %192 = arith.mulf %191, %174 : vector<1x128xf32>
      %cst_73 = arith.constant 1.000000e+00 : f32
      %193 = vector.broadcast %cst_73 : f32 to vector<1x128xf32>
      %194 = arith.addf %192, %193 : vector<1x128xf32>
      %cst_74 = arith.constant 1.000000e+00 : f32
      %195 = vector.broadcast %cst_74 : f32 to vector<1x128xf32>
      %196 = arith.subf %195, %174 : vector<1x128xf32>
      %cst_75 = arith.constant 1.250000e+00 : f32
      %197 = vector.broadcast %cst_75 : f32 to vector<1x128xf32>
      %198 = arith.mulf %197, %196 : vector<1x128xf32>
      %cst_76 = arith.constant 2.250000e+00 : f32
      %199 = vector.broadcast %cst_76 : f32 to vector<1x128xf32>
      %200 = arith.subf %198, %199 : vector<1x128xf32>
      %201 = arith.mulf %200, %196 : vector<1x128xf32>
      %202 = arith.mulf %201, %196 : vector<1x128xf32>
      %cst_77 = arith.constant 1.000000e+00 : f32
      %203 = vector.broadcast %cst_77 : f32 to vector<1x128xf32>
      %204 = arith.addf %202, %203 : vector<1x128xf32>
      %cst_78 = arith.constant 2.000000e+00 : f32
      %205 = vector.broadcast %cst_78 : f32 to vector<1x128xf32>
      %206 = arith.subf %205, %174 : vector<1x128xf32>
      %cst_79 = arith.constant -7.500000e-01 : f32
      %207 = vector.broadcast %cst_79 : f32 to vector<1x128xf32>
      %208 = arith.mulf %207, %206 : vector<1x128xf32>
      %cst_80 = arith.constant -3.750000e+00 : f32
      %209 = vector.broadcast %cst_80 : f32 to vector<1x128xf32>
      %210 = arith.subf %208, %209 : vector<1x128xf32>
      %211 = arith.mulf %210, %206 : vector<1x128xf32>
      %cst_81 = arith.constant -6.000000e+00 : f32
      %212 = vector.broadcast %cst_81 : f32 to vector<1x128xf32>
      %213 = arith.addf %211, %212 : vector<1x128xf32>
      %214 = arith.mulf %213, %206 : vector<1x128xf32>
      %cst_82 = arith.constant -3.000000e+00 : f32
      %215 = vector.broadcast %cst_82 : f32 to vector<1x128xf32>
      %216 = arith.subf %214, %215 : vector<1x128xf32>
      %217 = arith.fptosi %129 : vector<1x128xf32> to vector<1x128xi32>
      %218 = tpu.iota {dimensions = array<i32: 0>} : vector<16x128xi32>
      %cst_83 = arith.constant 0.000000e+00 : f32
      %219 = vector.broadcast %cst_83 : f32 to vector<16x128xf32>
      %c-1_i32_84 = arith.constant -1 : i32
      %220 = vector.broadcast %c-1_i32_84 : i32 to vector<1x128xi32>
      %221 = arith.addi %217, %220 : vector<1x128xi32>
      %c0_i32_85 = arith.constant 0 : i32
      %222 = vector.broadcast %c0_i32_85 : i32 to vector<1x128xi32>
      %223 = arith.cmpi sge, %221, %222 : vector<1x128xi32>
      %c16_i32_86 = arith.constant 16 : i32
      %224 = vector.broadcast %c16_i32_86 : i32 to vector<1x128xi32>
      %225 = arith.cmpi slt, %221, %224 : vector<1x128xi32>
      %226 = arith.andi %223, %225 : vector<1x128xi1>
      %227 = vector.broadcast %221 : vector<1x128xi32> to vector<16x128xi32>
      %228 = arith.cmpi eq, %218, %227 : vector<16x128xi32>
      %229 = vector.broadcast %226 : vector<1x128xi1> to vector<16x128xi1>
      %230 = arith.andi %228, %229 : vector<16x128xi1>
      %cst_87 = arith.constant 0.000000e+00 : f32
      %231 = vector.shape_cast %143 : vector<1x128xf32> to vector<1x128xf32>
      %232 = vector.broadcast %231 : vector<1x128xf32> to vector<16x128xf32>
      %233 = vector.broadcast %cst_87 : f32 to vector<16x128xf32>
      %234 = arith.select %230, %232, %233 : vector<16x128xi1>, vector<16x128xf32>
      %235 = arith.addf %219, %234 : vector<16x128xf32>
      %c0_i32_88 = arith.constant 0 : i32
      %236 = vector.broadcast %c0_i32_88 : i32 to vector<1x128xi32>
      %237 = arith.addi %217, %236 : vector<1x128xi32>
      %c0_i32_89 = arith.constant 0 : i32
      %238 = vector.broadcast %c0_i32_89 : i32 to vector<1x128xi32>
      %239 = arith.cmpi sge, %237, %238 : vector<1x128xi32>
      %c16_i32_90 = arith.constant 16 : i32
      %240 = vector.broadcast %c16_i32_90 : i32 to vector<1x128xi32>
      %241 = arith.cmpi slt, %237, %240 : vector<1x128xi32>
      %242 = arith.andi %239, %241 : vector<1x128xi1>
      %243 = vector.broadcast %237 : vector<1x128xi32> to vector<16x128xi32>
      %244 = arith.cmpi eq, %218, %243 : vector<16x128xi32>
      %245 = vector.broadcast %242 : vector<1x128xi1> to vector<16x128xi1>
      %246 = arith.andi %244, %245 : vector<16x128xi1>
      %cst_91 = arith.constant 0.000000e+00 : f32
      %247 = vector.shape_cast %151 : vector<1x128xf32> to vector<1x128xf32>
      %248 = vector.broadcast %247 : vector<1x128xf32> to vector<16x128xf32>
      %249 = vector.broadcast %cst_91 : f32 to vector<16x128xf32>
      %250 = arith.select %246, %248, %249 : vector<16x128xi1>, vector<16x128xf32>
      %251 = arith.addf %235, %250 : vector<16x128xf32>
      %c1_i32_92 = arith.constant 1 : i32
      %252 = vector.broadcast %c1_i32_92 : i32 to vector<1x128xi32>
      %253 = arith.addi %217, %252 : vector<1x128xi32>
      %c0_i32_93 = arith.constant 0 : i32
      %254 = vector.broadcast %c0_i32_93 : i32 to vector<1x128xi32>
      %255 = arith.cmpi sge, %253, %254 : vector<1x128xi32>
      %c16_i32_94 = arith.constant 16 : i32
      %256 = vector.broadcast %c16_i32_94 : i32 to vector<1x128xi32>
      %257 = arith.cmpi slt, %253, %256 : vector<1x128xi32>
      %258 = arith.andi %255, %257 : vector<1x128xi1>
      %259 = vector.broadcast %253 : vector<1x128xi32> to vector<16x128xi32>
      %260 = arith.cmpi eq, %218, %259 : vector<16x128xi32>
      %261 = vector.broadcast %258 : vector<1x128xi1> to vector<16x128xi1>
      %262 = arith.andi %260, %261 : vector<16x128xi1>
      %cst_95 = arith.constant 0.000000e+00 : f32
      %263 = vector.shape_cast %161 : vector<1x128xf32> to vector<1x128xf32>
      %264 = vector.broadcast %263 : vector<1x128xf32> to vector<16x128xf32>
      %265 = vector.broadcast %cst_95 : f32 to vector<16x128xf32>
      %266 = arith.select %262, %264, %265 : vector<16x128xi1>, vector<16x128xf32>
      %267 = arith.addf %251, %266 : vector<16x128xf32>
      %c2_i32_96 = arith.constant 2 : i32
      %268 = vector.broadcast %c2_i32_96 : i32 to vector<1x128xi32>
      %269 = arith.addi %217, %268 : vector<1x128xi32>
      %c0_i32_97 = arith.constant 0 : i32
      %270 = vector.broadcast %c0_i32_97 : i32 to vector<1x128xi32>
      %271 = arith.cmpi sge, %269, %270 : vector<1x128xi32>
      %c16_i32_98 = arith.constant 16 : i32
      %272 = vector.broadcast %c16_i32_98 : i32 to vector<1x128xi32>
      %273 = arith.cmpi slt, %269, %272 : vector<1x128xi32>
      %274 = arith.andi %271, %273 : vector<1x128xi1>
      %275 = vector.broadcast %269 : vector<1x128xi32> to vector<16x128xi32>
      %276 = arith.cmpi eq, %218, %275 : vector<16x128xi32>
      %277 = vector.broadcast %274 : vector<1x128xi1> to vector<16x128xi1>
      %278 = arith.andi %276, %277 : vector<16x128xi1>
      %cst_99 = arith.constant 0.000000e+00 : f32
      %279 = vector.shape_cast %173 : vector<1x128xf32> to vector<1x128xf32>
      %280 = vector.broadcast %279 : vector<1x128xf32> to vector<16x128xf32>
      %281 = vector.broadcast %cst_99 : f32 to vector<16x128xf32>
      %282 = arith.select %278, %280, %281 : vector<16x128xi1>, vector<16x128xf32>
      %283 = arith.addf %267, %282 : vector<16x128xf32>
      %c0_100 = arith.constant 0 : index
      %c0_101 = arith.constant 0 : index
      %284 = vector.load %arg7[%c0_100, %c0_101] : memref<16x128xf32, #tpu.memory_space<vmem>>, vector<16x128xf32>
      tpu.vector_store %arg7[%c0_100, %c0_101], %283 {strides = array<i32>} : memref<16x128xf32, #tpu.memory_space<vmem>>, vector<16x128xf32>,
      %c0_102 = arith.constant 0 : index
      %c0_103 = arith.constant 0 : index
      %285 = vector.load %arg8[%c0_102, %c0_103] : memref<8x128xf32, #tpu.memory_space<vmem>>, vector<1x128xf32>
      tpu.vector_store %arg8[%c0_102, %c0_103], %186 {strides = array<i32>} : memref<8x128xf32, #tpu.memory_space<vmem>>, vector<1x128xf32>,
      %c1 = arith.constant 1 : index
      %c0_104 = arith.constant 0 : index
      %286 = vector.load %arg8[%c1, %c0_104] : memref<8x128xf32, #tpu.memory_space<vmem>>, vector<1x128xf32>
      tpu.vector_store %arg8[%c1, %c0_104], %194 {strides = array<i32>} : memref<8x128xf32, #tpu.memory_space<vmem>>, vector<1x128xf32>,
      %c2 = arith.constant 2 : index
      %c0_105 = arith.constant 0 : index
      %287 = vector.load %arg8[%c2, %c0_105] : memref<8x128xf32, #tpu.memory_space<vmem>>, vector<1x128xf32>
      tpu.vector_store %arg8[%c2, %c0_105], %204 {strides = array<i32>} : memref<8x128xf32, #tpu.memory_space<vmem>>, vector<1x128xf32>,
      %c3 = arith.constant 3 : index
      %c0_106 = arith.constant 0 : index
      %288 = vector.load %arg8[%c3, %c0_106] : memref<8x128xf32, #tpu.memory_space<vmem>>, vector<1x128xf32>
      tpu.vector_store %arg8[%c3, %c0_106], %216 {strides = array<i32>} : memref<8x128xf32, #tpu.memory_space<vmem>>, vector<1x128xf32>,
      %c4 = arith.constant 4 : index
      %c0_107 = arith.constant 0 : index
      %289 = vector.load %arg8[%c4, %c0_107] : memref<8x128xf32, #tpu.memory_space<vmem>>, vector<1x128xf32>
      tpu.vector_store %arg8[%c4, %c0_107], %130 {strides = array<i32>} : memref<8x128xf32, #tpu.memory_space<vmem>>, vector<1x128xf32>,
    } else {
    }
    %c0 = arith.constant 0 : index
    %c0_1 = arith.constant 0 : index
    %3 = vector.load %arg8[%c0, %c0_1] : memref<8x128xf32, #tpu.memory_space<vmem>>, vector<8x128xf32>
    %4 = vector.extract_strided_slice %3 {offsets = [4, 0], sizes = [1, 128], strides = [1, 1]} : vector<8x128xf32> to vector<1x128xf32>
    %5 = arith.fptosi %4 : vector<1x128xf32> to vector<1x128xi32>
    %c16_i32 = arith.constant 16 : i32
    %6 = arith.muli %arg2, %c16_i32 : i32
    %7 = tpu.iota {dimensions = array<i32: 0>} : vector<16x128xi32>
    %8 = vector.broadcast %6 : i32 to vector<16x128xi32>
    %9 = arith.addi %7, %8 : vector<16x128xi32>
    %cst = arith.constant 0.000000e+00 : f32
    %10 = vector.broadcast %cst : f32 to vector<16x128xf32>
    %c-1_i32 = arith.constant -1 : i32
    %11 = vector.broadcast %c-1_i32 : i32 to vector<1x128xi32>
    %12 = arith.addi %5, %11 : vector<1x128xi32>
    %c0_i32_2 = arith.constant 0 : i32
    %13 = vector.broadcast %c0_i32_2 : i32 to vector<1x128xi32>
    %14 = arith.cmpi sge, %12, %13 : vector<1x128xi32>
    %c16_i32_3 = arith.constant 16 : i32
    %15 = vector.broadcast %c16_i32_3 : i32 to vector<1x128xi32>
    %16 = arith.cmpi slt, %12, %15 : vector<1x128xi32>
    %17 = arith.andi %14, %16 : vector<1x128xi1>
    %18 = vector.broadcast %12 : vector<1x128xi32> to vector<16x128xi32>
    %19 = arith.cmpi eq, %9, %18 : vector<16x128xi32>
    %20 = vector.broadcast %17 : vector<1x128xi1> to vector<16x128xi1>
    %21 = arith.andi %19, %20 : vector<16x128xi1>
    %22 = vector.extract_strided_slice %3 {offsets = [0, 0], sizes = [1, 128], strides = [1, 1]} : vector<8x128xf32> to vector<1x128xf32>
    %cst_4 = arith.constant 0.000000e+00 : f32
    %23 = vector.shape_cast %22 : vector<1x128xf32> to vector<1x128xf32>
    %24 = vector.broadcast %23 : vector<1x128xf32> to vector<16x128xf32>
    %25 = vector.broadcast %cst_4 : f32 to vector<16x128xf32>
    %26 = arith.select %21, %24, %25 : vector<16x128xi1>, vector<16x128xf32>
    %27 = arith.addf %10, %26 : vector<16x128xf32>
    %c0_i32_5 = arith.constant 0 : i32
    %28 = vector.broadcast %c0_i32_5 : i32 to vector<1x128xi32>
    %29 = arith.addi %5, %28 : vector<1x128xi32>
    %c0_i32_6 = arith.constant 0 : i32
    %30 = vector.broadcast %c0_i32_6 : i32 to vector<1x128xi32>
    %31 = arith.cmpi sge, %29, %30 : vector<1x128xi32>
    %c16_i32_7 = arith.constant 16 : i32
    %32 = vector.broadcast %c16_i32_7 : i32 to vector<1x128xi32>
    %33 = arith.cmpi slt, %29, %32 : vector<1x128xi32>
    %34 = arith.andi %31, %33 : vector<1x128xi1>
    %35 = vector.broadcast %29 : vector<1x128xi32> to vector<16x128xi32>
    %36 = arith.cmpi eq, %9, %35 : vector<16x128xi32>
    %37 = vector.broadcast %34 : vector<1x128xi1> to vector<16x128xi1>
    %38 = arith.andi %36, %37 : vector<16x128xi1>
    %39 = vector.extract_strided_slice %3 {offsets = [1, 0], sizes = [1, 128], strides = [1, 1]} : vector<8x128xf32> to vector<1x128xf32>
    %cst_8 = arith.constant 0.000000e+00 : f32
    %40 = vector.shape_cast %39 : vector<1x128xf32> to vector<1x128xf32>
    %41 = vector.broadcast %40 : vector<1x128xf32> to vector<16x128xf32>
    %42 = vector.broadcast %cst_8 : f32 to vector<16x128xf32>
    %43 = arith.select %38, %41, %42 : vector<16x128xi1>, vector<16x128xf32>
    %44 = arith.addf %27, %43 : vector<16x128xf32>
    %c1_i32 = arith.constant 1 : i32
    %45 = vector.broadcast %c1_i32 : i32 to vector<1x128xi32>
    %46 = arith.addi %5, %45 : vector<1x128xi32>
    %c0_i32_9 = arith.constant 0 : i32
    %47 = vector.broadcast %c0_i32_9 : i32 to vector<1x128xi32>
    %48 = arith.cmpi sge, %46, %47 : vector<1x128xi32>
    %c16_i32_10 = arith.constant 16 : i32
    %49 = vector.broadcast %c16_i32_10 : i32 to vector<1x128xi32>
    %50 = arith.cmpi slt, %46, %49 : vector<1x128xi32>
    %51 = arith.andi %48, %50 : vector<1x128xi1>
    %52 = vector.broadcast %46 : vector<1x128xi32> to vector<16x128xi32>
    %53 = arith.cmpi eq, %9, %52 : vector<16x128xi32>
    %54 = vector.broadcast %51 : vector<1x128xi1> to vector<16x128xi1>
    %55 = arith.andi %53, %54 : vector<16x128xi1>
    %56 = vector.extract_strided_slice %3 {offsets = [2, 0], sizes = [1, 128], strides = [1, 1]} : vector<8x128xf32> to vector<1x128xf32>
    %cst_11 = arith.constant 0.000000e+00 : f32
    %57 = vector.shape_cast %56 : vector<1x128xf32> to vector<1x128xf32>
    %58 = vector.broadcast %57 : vector<1x128xf32> to vector<16x128xf32>
    %59 = vector.broadcast %cst_11 : f32 to vector<16x128xf32>
    %60 = arith.select %55, %58, %59 : vector<16x128xi1>, vector<16x128xf32>
    %61 = arith.addf %44, %60 : vector<16x128xf32>
    %c2_i32 = arith.constant 2 : i32
    %62 = vector.broadcast %c2_i32 : i32 to vector<1x128xi32>
    %63 = arith.addi %5, %62 : vector<1x128xi32>
    %c0_i32_12 = arith.constant 0 : i32
    %64 = vector.broadcast %c0_i32_12 : i32 to vector<1x128xi32>
    %65 = arith.cmpi sge, %63, %64 : vector<1x128xi32>
    %c16_i32_13 = arith.constant 16 : i32
    %66 = vector.broadcast %c16_i32_13 : i32 to vector<1x128xi32>
    %67 = arith.cmpi slt, %63, %66 : vector<1x128xi32>
    %68 = arith.andi %65, %67 : vector<1x128xi1>
    %69 = vector.broadcast %63 : vector<1x128xi32> to vector<16x128xi32>
    %70 = arith.cmpi eq, %9, %69 : vector<16x128xi32>
    %71 = vector.broadcast %68 : vector<1x128xi1> to vector<16x128xi1>
    %72 = arith.andi %70, %71 : vector<16x128xi1>
    %73 = vector.extract_strided_slice %3 {offsets = [3, 0], sizes = [1, 128], strides = [1, 1]} : vector<8x128xf32> to vector<1x128xf32>
    %cst_14 = arith.constant 0.000000e+00 : f32
    %74 = vector.shape_cast %73 : vector<1x128xf32> to vector<1x128xf32>
    %75 = vector.broadcast %74 : vector<1x128xf32> to vector<16x128xf32>
    %76 = vector.broadcast %cst_14 : f32 to vector<16x128xf32>
    %77 = arith.select %72, %75, %76 : vector<16x128xi1>, vector<16x128xf32>
    %78 = arith.addf %61, %77 : vector<16x128xf32>
    %c0_15 = arith.constant 0 : index
    %c0_16 = arith.constant 0 : index
    %c0_17 = arith.constant 0 : index
    %c0_18 = arith.constant 0 : index
    %79 = vector.load %arg4[%c0_15, %c0_16, %c0_17, %c0_18] : memref<1x4x16x16xf32, #tpu.memory_space<vmem>>, vector<1x4x16x16xf32>
    %80 = vector.shape_cast %79 : vector<1x4x16x16xf32> to vector<4x16x16xf32>
    %81 = vector.shape_cast %80 : vector<4x16x16xf32> to vector<64x16xf32>
    %c0_19 = arith.constant 0 : index
    %c0_20 = arith.constant 0 : index
    %82 = vector.load %arg7[%c0_19, %c0_20] : memref<16x128xf32, #tpu.memory_space<vmem>>, vector<16x128xf32>
    %cst_21 = arith.constant dense<0.000000e+00> : vector<64x128xf32>
    %83 = tpu.matmul %81, %82, %cst_21 {dimension_numbers = #tpu.dot_dimension_numbers<[1], [0], [0], [1], [0, 0, 1, 1], [], []>} : vector<64x16xf32>, vector<16x128xf32>, vector<64x128xf32> -> vector<64x128xf32>
    %c0_22 = arith.constant 0 : index
    %c0_23 = arith.constant 0 : index
    %84 = vector.load %arg6[%c0_22, %c0_23] : memref<4x128xf32, #tpu.memory_space<vmem>>, vector<4x128xf32>
    %85 = vector.shape_cast %83 : vector<64x128xf32> to vector<4x16x128xf32>
    %86 = vector.shape_cast %78 : vector<16x128xf32> to vector<1x16x128xf32>
    %87 = vector.broadcast %86 : vector<1x16x128xf32> to vector<4x16x128xf32>
    %88 = arith.mulf %85, %87 : vector<4x16x128xf32>
    %cst_24 = arith.constant dense<0.000000e+00> : vector<4x128xf32>
    %89 = vector.multi_reduction <add>, %88, %cst_24 [1] : vector<4x16x128xf32> to vector<4x128xf32>
    %90 = arith.addf %84, %89 : vector<4x128xf32>
    %c0_25 = arith.constant 0 : index
    %c0_26 = arith.constant 0 : index
    %91 = vector.load %arg6[%c0_25, %c0_26] : memref<4x128xf32, #tpu.memory_space<vmem>>, vector<4x128xf32>
    tpu.vector_store %arg6[%c0_25, %c0_26], %90 {strides = array<i32>} : memref<4x128xf32, #tpu.memory_space<vmem>>, vector<4x128xf32>,
    %c0_i32_27 = arith.constant 0 : i32
    %92 = arith.cmpi eq, %arg2, %c0_i32_27 : i32
    %93 = arith.extui %92 : i1 to i32
    %c0_i32_28 = arith.constant 0 : i32
    %94 = arith.cmpi ne, %93, %c0_i32_28 : i32
    scf.if %94 {
      %c0_29 = arith.constant 0 : index
      %c0_30 = arith.constant 0 : index
      %95 = vector.load %arg6[%c0_29, %c0_30] : memref<4x128xf32, #tpu.memory_space<vmem>>, vector<4x128xf32>
      %c0_31 = arith.constant 0 : index
      %c0_32 = arith.constant 0 : index
      %c0_33 = arith.constant 0 : index
      %96 = vector.load %arg5[%c0_31, %c0_32, %c0_33] : memref<1x4x128xf32, #tpu.memory_space<vmem>>, vector<1x4x128xf32>
      %97 = vector.shape_cast %96 : vector<1x4x128xf32> to vector<4x128xf32>
      %98 = vector.shape_cast %95 : vector<4x128xf32> to vector<1x4x128xf32>
      tpu.vector_store %arg5[%c0_31, %c0_32, %c0_33], %98 {strides = array<i32>} : memref<1x4x128xf32, #tpu.memory_space<vmem>>, vector<1x4x128xf32>,
    } else {
    }
    return
  }
  func.func @transform_0(%arg0: i32, %arg1: i32, %arg2: i32) -> (i32, i32, i32) {
    %c0_i32 = arith.constant 0 : i32
    %c0_i32_0 = arith.constant 0 : i32
    return %arg0, %c0_i32, %arg1 : i32, i32, i32
  }
  func.func @transform_1(%arg0: i32, %arg1: i32, %arg2: i32) -> (i32, i32, i32, i32) {
    %c0_i32 = arith.constant 0 : i32
    %c0_i32_0 = arith.constant 0 : i32
    %c0_i32_1 = arith.constant 0 : i32
    return %arg0, %c0_i32, %arg2, %c0_i32_0 : i32, i32, i32, i32
  }
  func.func @transform_2(%arg0: i32, %arg1: i32, %arg2: i32) -> (i32, i32, i32) {
    %c0_i32 = arith.constant 0 : i32
    %c0_i32_0 = arith.constant 0 : i32
    return %arg0, %c0_i32, %arg1 : i32, i32, i32
  }
}

</mosaic_0001>

<bundles_post_ra>
// kernel: tpu_custom_call.1
= control target key start
LH: loop header
LB: loop body
LE: loop exit
PB: predicated region body
PF: predicated region fallthrough
CT: control target
= control target key end

     0   :  { %7 = vsyncpa [#allocation6], 0  ;;  %s1480_s0 = inlined_call_operand.hbm [shape: f32[2,2,128], index: 0, kind: input, shape index: {}]   ;;  %s1481_s1 = inlined_call_operand.hbm [shape: f32[2,4,16,16], index: 1, kind: input, shape index: {}]   ;;  %s1482_s2 = inlined_call_operand.hbm [shape: f32[2,4,128], index: 2, kind: output, shape index: {}]  }
   0x1   :  { %9 = vsyncpa [#allocation6 + $0x1], 0 }
   0x2   :  { %10 = vsyncpa [#allocation9], 0 }
   0x3   :  { %12 = vsyncpa [#allocation9 + $0x1], 0 }
   0x4   :  { %13 = vsyncpa [#allocation7], 0 }
   0x5   :  { %15 = vsyncpa [#allocation7 + $0x1], 0  ;;  %s1117_s9 = smov 0   ;;  %s1119_s10 = smov 0  }
   0x6   :  { %s1121_s11 = smov 0   ;;  %s1123_s12 = smov 0  }
   0x7   :  { %s1125_s13 = smov 0   ;;  %s1127_s14 = smov 0  }
   0x8 LB: > { %s814_s15 = sadd.s32 4294967295, %s1093_s14   ;;  %s815_s16 = sadd.s32 4294967294, %s1093_s14   ;;  %s1093_s14 = sphi %s1127_s14, %s21_s14   ;;  %s1089_s13 = sphi %s1125_s13, %s1516_s13   ;;  %s1085_s12 = sphi %s1123_s12, %s1515_s12   ;;  %s1081_s11 = sphi %s1121_s11, %s1514_s11   ;;  %s1077_s10 = sphi %s1119_s10, %s1513_s10   ;;  %s1073_s9 = sphi %s1117_s9, %s1512_s9  }
   0x9   : > { %s40_s17 = sadd.s32 1, %s1089_s13  ;;  %s49_s18 = sadd.s32 1, %s1081_s11 }
   0xa   : > { %p42_p0 = scmp.ge.s32.totalorder %s40_s17, 2  ;;  %p56_p1 = scmp.ne.s32.totalorder %s1081_s11, %s1077_s10 }
   0xb   : > { %p57_p2 = scmp.eq.s32.totalorder %s1093_s14, 0  ;;  %p62_p3 = scmp.ne.s32.totalorder %s1077_s10, %s1073_s9 }
   0xc   : > { %s1518_s17 = smov (%p42_p0, %s40_s17), 0  ;;  %p63_p5 = scmp.eq.s32.totalorder %s814_s15, 0 }
   0xd   : > { %p1158_p4 = por %p57_p2, %p56_p1  ;;  %s44_s20 = ssub.s32 %s1089_s13, %s1518_s17 }
   0xe   : > { %p116_p6 = scmp.eq.s32.totalorder %s814_s15, 1  ;;  %p47_p7 = scmp.eq.s32.totalorder %s44_s20, 0 }
   0xf   : > { %p1164_p8 = por %p63_p5, %p62_p3  ;;  %p122_p10 = scmp.eq.s32.totalorder %s815_s16, 1 }
  0x10   : > { %p1168_p9 = por %p116_p6, %p56_p1  ;;  %p899_p13 = scmp.lt.s32.totalorder %s1093_s14, 2 }
  0x11   : > { %s1173_s23 = scalar_select %p47_p7, %s1081_s11, %s49_s18  }
  0x12   : > { %p1175_p11 = por %p122_p10, %p62_p3  ;;  %s1182_s25 = sand.u32 1, %s1081_s11  }
  0x13   : > { %s818_s26 = sshll.u32 %s1182_s25, 1  ;;  %s819_s27 = sshll.u32 %s1089_s13, 5 }
  0x14   : > { %s152_s30 = scalar_lea.hbm %s1480_s0, %s819_s27  ;;  %s146_s3 = scalar_lea.vmem [#allocation5], %s818_s26 }
  0x15   : > { %s154_s4 = sshll.u32 %s146_s3, 4  ;;  %p1191_p0 = pnand %p899_p13, %p1158_p4  ;;  %s155_s4 = int_to_ptr.vmem [resolvable:$true] %s154_s4 }
  0x16   : > { %p823_p1 = scmp.ge.s32.totalorder %s1093_s14, 1  ;;  %p182_p2 = scmp.lt.s32.totalorder %s1093_s14, 3 }
  0x17   : > { %s143_s6 = scalar_lea.sflag [#allocation6], %s1182_s25  ;;  %p955_p3 = pneg %p1191_p0 }
  0x18   : > { %s966_s7 = scalar_lea.vmem %s155_s4, 32  ;;  %s1095_s8 = smov [#allocation5]  }
  0x19   : > { %p967_p5 = scmp.ne.s32.totalorder %s155_s4, %s966_s7  ;;  %s971_s15 = sshll.u32 %s1095_s8, 4  ;;  %s972_s15 = int_to_ptr.vmem [resolvable:$false] %s971_s15 }
  0x1a   : > { %s973_s16 = scalar_lea.vmem %s972_s15, 64  ;;  %p974_p4 = scmp.lt.s32.totalorder %s155_s4, %s972_s15 }
  0x1b   : > { %p969_p6 = pnand %p967_p5, %p955_p3  ;;  %p975_p10 = scmp.lt.s32.totalorder %s973_s16, %s966_s7 }
  0x1d   : > { %p970_p7 = pneg %p969_p6  ;;  %p976_p13 = por %p975_p10, %p974_p4 }
  0x1f   : > { %p977_p12 = pnand %p976_p13, %p970_p7 }
  0x21   : > { %980 = shalt.err (!%p977_p12)
}
  0x22   : > { %891 = dma.hbm_to_vmem [thread:$0]  (!%p1191_p0), %s152_s30, 32, %s155_s4, %s143_s6  }
  0x23   : > { %p1209_p5 = pnand %p823_p1, %p182_p2  ;;  %s820_s19 = sshll.u32 %s1182_s25, 6 }
  0x24   : > { %s847_s20 = sshll.u32 %s1089_s13, 10  ;;  %s165_s29 = scalar_lea.vmem [#allocation8], %s820_s19 }
  0x25   : > { %s173_s28 = scalar_lea.hbm %s1481_s1, %s847_s20  ;;  %s174_s3 = sshll.u32 %s165_s29, 4  ;;  %s175_s3 = int_to_ptr.vmem [resolvable:$true] %s174_s3 }
  0x26   : > { %s162_s7 = scalar_lea.sflag [#allocation9], %s1182_s25  ;;  %s994_s8 = scalar_lea.vmem %s175_s3, 1024 }
  0x27   : > { %p995_p12 = scmp.ne.s32.totalorder %s175_s3, %s994_s8  ;;  %s1096_s30 = smov [#allocation8]  }
  0x28   : > { %s999_s4 = sshll.u32 %s1096_s30, 4  ;;  %s1000_s4 = int_to_ptr.vmem [resolvable:$false] %s999_s4 }
  0x29   : > { %p997_p6 = pnand %p995_p12, %p955_p3  ;;  %s1001_s6 = scalar_lea.vmem %s1000_s4, 2048 }
  0x2a   : > { %p1002_p1 = scmp.lt.s32.totalorder %s175_s3, %s1000_s4  ;;  %p1003_p2 = scmp.lt.s32.totalorder %s1001_s6, %s994_s8 }
  0x2b   : > { %p998_p7 = pneg %p997_p6 }
  0x2c   : > { %p1004_p4 = por %p1003_p2, %p1002_p1 }
  0x2e   : > { %p1005_p10 = pnand %p1004_p4, %p998_p7 }
  0x30   : > { %1008 = shalt.err (!%p1005_p10)
}
  0x31   : > { %s1097_s15 = smov 128   ;;  %s1098_s16 = smov 8  }
  0x32   : > { %894 = dma.hbm_to_vmem [thread:$0]  (!%p1191_p0), %s173_s28, 1024, %s175_s3, %s162_s7, %s1097_s15, %s1097_s15, %s1098_s16  }
  0x33   : > { %186 = sbr.rel (%p1209_p5) target bundleno = 350 (0x15e), region = 28  ;;  %s1227_s25 = sand.u32 (!%p1209_p5), 1, %s1077_s10  }
  0x34   : > { %s824_s19 = sshll.u32 (!%p1209_p5), %s1227_s25, 1  ;;  %s189_s20 = scalar_lea.sflag (!%p1209_p5), [#allocation6], %s1227_s25 }
  0x35   : > { %s192_s26 = scalar_lea.vmem (!%p1209_p5), [#allocation5], %s824_s19 }
  0x38   : > { %1060 = dma.done.wait (%p1164_p8), %s189_s20, 32  }
  0x39   : > { %1062 = vsyncadd (%p1164_p8), %s189_s20, 4294967264  ;;  %s825_s5 = sshll.u32 %s1227_s25, 6  ;;  %s198_s18 = scalar_lea.sflag [#allocation9], %s1227_s25 }
  0x3a   : > { %s1237_s27 = scalar_lea.vmem [#allocation8], %s825_s5 }
  0x3b   : > { %1064 = dma.done.wait (%p1164_p8), %s198_s18, 1024  }
  0x3c   : > { %1066 = vsyncadd (%p1164_p8), %s198_s18, 4294966272  ;;  %vm505_vm0 = vcmask 130048   ;;  %v233_v0 = vld [vmem:[%s192_s26] sm:$0x3]  ;;  %v495_v1 = vld [vmem:[%s1237_s27] sm:$0xff]  ;;  %v270_v8 = vlaneseq  ;;  %v1099_v37 = vmov 0  }
  0x3d   : > { %v499_v2 = vld [vmem:[%s1237_s27 + $0x20] sm:$0xff]  ;;  %v234_v3 = vmul.f32 2.0, %v233_v0  ;;  %862 = vmatprep.mubr.msk.f32.mxu0 %vm505_vm0, %v495_v1  ;;  %s826_s21 = sshll.u32 %s1227_s25, 2  ;;  %s844_s28 = sshll.u32 %s1085_s12, 6 }
  0x3e   : > { %868 = vmatprep.mubr.msk.f32.mxu1 %vm505_vm0, %v499_v2  ;;  %v1247_v11 = vshrl.u32 %v270_v8, 7  ;;  %s226_s29 = scalar_lea.vmem [#allocation10], %s826_s21  ;;  %s1438_s30 = scalar_lea.hbm %s1482_s2, %s844_s28 }
  0x3f   : > { %v236_v4 = vmul.f32 0.06666667, %v234_v3  ;;  %s705_s3 = sshll.u32 %s226_s29, 4  ;;  %s691_s4 = scalar_lea.sflag [#allocation7], %s1227_s25  ;;  %s706_s3 = int_to_ptr.vmem [resolvable:$true] %s705_s3 }
  0x40   : > { %v1250_v15 = vsub.s32 0, %v1247_v11  ;;  %v1253_v21 = vadd.s32 8, %v1247_v11  ;;  %s1009_s6 = scalar_lea.vmem %s706_s3, 64  ;;  %s1101_s15 = smov [#allocation10]  }
  0x41   : > { %v827_v5 = vadd.f32 -1.0, %v236_v4  ;;  %p1010_p8 = scmp.ne.s32.totalorder %s706_s3, %s1009_s6  ;;  %s1013_s16 = sshll.u32 %s1101_s15, 4  ;;  %s1014_s16 = int_to_ptr.vmem [resolvable:$false] %s1013_s16 }
  0x42   : > { %s1015_s12 = scalar_lea.vmem %s1014_s16, 128  ;;  %p1016_p13 = scmp.lt.s32.totalorder %s706_s3, %s1014_s16 }
  0x43   : > { %v238_v6 = vadd.f32 1.0, %v827_v5  ;;  %p1011_p0 = pnand %p1010_p8, %p1168_p9  ;;  %p1017_p5 = scmp.lt.s32.totalorder %s1015_s12, %s1009_s6 }
  0x45   : > { %v239_v7 = vmul.f32 16.0, %v238_v6  ;;  %p1012_p3 = pneg %p1011_p0  ;;  %p1018_p12 = por %p1017_p5, %p1016_p13 }
  0x47   : > { %v828_v9 = vadd.f32 -1.0, %v239_v7  ;;  %p1019_p6 = pnand %p1018_p12, %p1012_p3 }
  0x49   : > { %v241_v10 = vmul.f32 0.5, %v828_v9 }
  0x4b   : > { %v242_v12 = vfloor.f32 %v241_v10 }
  0x4d   : > { %v243_v13 = vsub.f32 %v241_v10, %v242_v12  ;;  %v878_v14 = vtrunc.f32 %v242_v12  ;;  %382 = vst [vmem:[#allocation4 + $0x3] sm:$0x2] %v242_v12 }
  0x4f   : > { %v244_v16 = vadd.f32 1.0, %v243_v13  ;;  %v251_v17 = vmul.f32 1.25, %v243_v13  ;;  %v256_v18 = vsub.f32 1.0, %v243_v13  ;;  %v262_v19 = vsub.f32 2.0, %v243_v13 }
  0x50   : > { %v879_v20 = vcvt.f32.s32 %v878_v14 }
  0x51   : > { %v245_v22 = vmul.f32 -0.75, %v244_v16  ;;  %v831_v23 = vadd.f32 -2.25, %v251_v17  ;;  %v257_v24 = vmul.f32 1.25, %v256_v18  ;;  %v263_v25 = vmul.f32 -0.75, %v262_v19 }
  0x52   : > { %v273_v26 = vadd.s32 4294967295, %v879_v20  ;;  %vm299_vm1 = vcmp.ge.s32.totalorder %v879_v20, 0  ;;  %vm300_vm2 = vcmp.lt.s32.totalorder %v879_v20, 16  ;;  %v1256_v27 = vrot.slane %v879_v20, %v1250_v15 }
  0x53   : > { %v829_v28 = vadd.f32 3.75, %v245_v22  ;;  %v253_v29 = vmul.f32 %v831_v23, %v243_v13  ;;  %v832_v30 = vadd.f32 -2.25, %v257_v24  ;;  %v833_v31 = vadd.f32 3.75, %v263_v25  ;;  %vm301_vm3 = vmand %vm299_vm1, %vm300_vm2 }
  0x54   : > { %vm274_vm4 = vcmp.ge.s32.totalorder %v273_v26, 0  ;;  %vm275_vm5 = vcmp.lt.s32.totalorder %v273_v26, 16  ;;  %v280_v32 = vrot.slane %v273_v26, %v1250_v15  ;;  %vm307_vm6 = vcmp.eq.s32.totalorder %v1253_v21, %v1256_v27 }
  0x55   : > { %v247_v33 = vmul.f32 %v829_v28, %v244_v16  ;;  %v254_v34 = vmul.f32 %v253_v29, %v243_v13  ;;  %v259_v35 = vmul.f32 %v832_v30, %v256_v18  ;;  %v265_v36 = vmul.f32 %v833_v31, %v262_v19  ;;  %vm276_vm7 = vmand %vm274_vm4, %vm275_vm5  ;;  %v496_v30 = vld [vmem:[%s1237_s27 + $0x8] sm:$0xff] }
  0x56   : > { %vm282_vm8 = vcmp.eq.s32.totalorder %v1253_v21, %v280_v32  ;;  %v283_v38 = vsel %vm276_vm7, 1, %v1099_v37  ;;  %v308_v39 = vsel %vm301_vm3, 1, %v1099_v37  ;;  %v324_v40 = vadd.s32 1, %v879_v20  ;;  %v500_v31 = vld [vmem:[%s1237_s27 + $0x28] sm:$0xff] }
  0x57   : > { %v248_v41 = vadd.f32 -6.0, %v247_v33  ;;  %v255_v42 = vadd.f32 1.0, %v254_v34  ;;  %v260_v43 = vmul.f32 %v259_v35, %v256_v18  ;;  %v266_v44 = vadd.f32 -6.0, %v265_v36  ;;  %v497_v34 = vld [vmem:[%s1237_s27 + $0x10] sm:$0xff] }
  0x58   : > { %v287_v45 = vrot.slane %v283_v38, %v1250_v15  ;;  %v312_v46 = vrot.slane %v308_v39, %v1250_v15  ;;  %vm325_vm9 = vcmp.ge.s32.totalorder %v324_v40, 0  ;;  %vm326_vm10 = vcmp.lt.s32.totalorder %v324_v40, 16  ;;  %v501_v35 = vld [vmem:[%s1237_s27 + $0x30] sm:$0xff] }
  0x59   : > { %v249_v47 = vmul.f32 %v248_v41, %v244_v16  ;;  %v261_v48 = vadd.f32 1.0, %v260_v43  ;;  %v267_v49 = vmul.f32 %v266_v44, %v262_v19  ;;  %v319_v50 = vrot.slane %v255_v42, %v1250_v15  ;;  %vm327_vm11 = vmand %vm325_vm9, %vm326_vm10  ;;  %379 = vst [vmem:[#allocation4] sm:$0x2] %v255_v42  ;;  %v498_v44 = vld [vmem:[%s1237_s27 + $0x18] sm:$0xff] }
  0x5a   : > { %vm1267_vm12 = vcmp.eq.s32.totalorder %v287_v45, 1  ;;  %vm1271_vm13 = vcmp.eq.s32.totalorder %v312_v46, 1  ;;  %v331_v53 = vrot.slane %v324_v40, %v1250_v15  ;;  %v334_v54 = vsel %vm327_vm11, 1, %v1099_v37  ;;  %v502_v45 = vld [vmem:[%s1237_s27 + $0x38] sm:$0xff] }
  0x5b   : > { %v830_v55 = vadd.f32 3.0, %v249_v47  ;;  %v834_v56 = vadd.f32 3.0, %v267_v49  ;;  %vm1281_vm14 = vmand %vm282_vm8, %vm1267_vm12  ;;  %v338_v58 = vrot.slane %v334_v54, %v1250_v15  ;;  %v345_v59 = vrot.slane %v261_v48, %v1250_v15  ;;  %380 = vst [vmem:[#allocation4 + $0x1] sm:$0x2] %v261_v48 }
  0x5c   : > { %vm1292_vm15 = vmand %vm307_vm6, %vm1271_vm13  ;;  %vm333_vm1 = vcmp.eq.s32.totalorder %v1253_v21, %v331_v53  ;;  %v350_v61 = vadd.s32 2, %v879_v20  ;;  %vm281_vm2 = vcmp.eq.s32.totalorder %v1247_v11, %v280_v32  ;;  %vm306_vm5 = vcmp.eq.s32.totalorder %v1247_v11, %v1256_v27 }
  0x5d   : > { %v294_v62 = vrot.slane %v830_v55, %v1250_v15  ;;  %v321_v63 = vsel %vm1292_vm15, %v319_v50, 0.0  ;;  %vm1301_vm3 = vcmp.eq.s32.totalorder %v338_v58, 1  ;;  %378 = vst [vmem:[#allocation4 - $0x1] sm:$0x2] %v830_v55  ;;  %381 = vst [vmem:[#allocation4 + $0x2] sm:$0x2] %v834_v56  ;;  %vm332_vm9 = vcmp.eq.s32.totalorder %v1247_v11, %v331_v53 }
  0x5e   : > { %vm1307_vm4 = vmand %vm281_vm2, %vm1267_vm12  ;;  %vm351_vm7 = vcmp.ge.s32.totalorder %v350_v61, 0  ;;  %vm352_vm8 = vcmp.lt.s32.totalorder %v350_v61, 16  ;;  %v357_v3 = vrot.slane %v350_v61, %v1250_v15  ;;  %v371_v10 = vrot.slane %v834_v56, %v1250_v15 }
  0x5f   : > { %vm1315_vm6 = vmand %vm333_vm1, %vm1301_vm3  ;;  %v296_v4 = vsel %vm1281_vm14, %v294_v62, 0.0  ;;  %v295_v6 = vsel %vm1307_vm4, %v294_v62, 0.0  ;;  %v1340_v22 = vsub.s32 4, %v1247_v11  ;;  %v437_v25 = vsub.s32 1, %v1247_v11 }
  0x60   : > { %v347_v5 = vsel %vm1315_vm6, %v345_v59, 0.0  ;;  %vm353_vm10 = vmand %vm351_vm7, %vm352_vm8  ;;  %v323_v7 = vadd.f32 %v321_v63, %v296_v4  ;;  %vm359_vm12 = vcmp.eq.s32.totalorder %v1253_v21, %v357_v3  ;;  %vm358_vm15 = vcmp.eq.s32.totalorder %v1247_v11, %v357_v3 }
  0x61   : > { %v360_v8 = vsel %vm353_vm10, 1, %v1099_v37  ;;  %vm314_vm11 = vmand %vm306_vm5, %vm1271_vm13  ;;  %v463_v28 = vsub.s32 2, %v1247_v11  ;;  %v489_v29 = vsub.s32 3, %v1247_v11 }
  0x62   : > { %v364_v9 = vrot.slane %v360_v8, %v1250_v15  ;;  %v320_v12 = vsel %vm314_vm11, %v319_v50, 0.0  ;;  %vm340_vm14 = vmand %vm332_vm9, %vm1301_vm3  ;;  %v349_v13 = vadd.f32 %v347_v5, %v323_v7  ;;  %v1100_v7 = vmov 0.0  }
  0x63   : > { %v322_v14 = vadd.f32 %v320_v12, %v295_v6  ;;  %v346_v16 = vsel %vm340_vm14, %v345_v59, 0.0  ;;  %232 = vst [vmem:[#allocation2] sm:$0xf] %v1100_v7 }
  0x64   : > { %vm365_vm1 = vcmp.eq.s32.totalorder %v364_v9, 1  ;;  %v1336_v18 = vld [vmem:[#allocation4] sm:$0xff] }
  0x65   : > { %vm367_vm2 = vmand %vm359_vm12, %vm365_vm1  ;;  %v348_v17 = vadd.f32 %v346_v16, %v322_v14  ;;  %v880_v20 = vtrunc.f32 %v1336_v18  ;;  %v1354_v36 = vrot.slane %v1336_v18, %v1250_v15  ;;  %v1357_v38 = vrot.slane %v1336_v18, %v437_v25 }
  0x66   : > { %v373_v19 = vsel %vm367_vm2, %v371_v10, 0.0  ;;  %vm366_vm13 = vmand %vm358_vm15, %vm365_vm1  ;;  %v464_v42 = vrot.slane %v1336_v18, %v463_v28  ;;  %v490_v55 = vrot.slane %v1336_v18, %v489_v29 }
  0x67   : > { %v375_v23 = vadd.f32 %v373_v19, %v349_v13  ;;  %v372_v24 = vsel %vm366_vm13, %v371_v10, 0.0  ;;  %v881_v27 = vcvt.f32.s32 %v880_v20 }
  0x68   : > { %v374_v26 = vadd.f32 %v372_v24, %v348_v17 }
  0x69   : > { %858 = vmatprep.subr.mxu0 %v375_v23  ;;  %874 = vmatprep.subr.mxu1 %v375_v23  ;;  %v392_v32 = vadd.s32 4294967295, %v881_v27  ;;  %vm418_vm3 = vcmp.ge.s32.totalorder %v881_v27, 0  ;;  %vm419_vm4 = vcmp.lt.s32.totalorder %v881_v27, 16  ;;  %v1348_v33 = vrot.slane %v881_v27, %v1340_v22 }
  0x6a   : > { %859 = vmatpush3.msra.mxu0 %v375_v23  ;;  %876 = vmatpush3.msra.mxu1 %v375_v23  ;;  %vm420_vm5 = vmand %vm418_vm3, %vm419_vm4  ;;  %v443_v39 = vadd.s32 1, %v881_v27  ;;  %v469_v40 = vadd.s32 2, %v881_v27 }
  0x6b   : > { %860 = vmatprep.subr.mxu0 %v374_v26  ;;  %875 = vmatprep.subr.mxu1 %v374_v26  ;;  %vm393_vm6 = vcmp.ge.s32.totalorder %v392_v32, 0  ;;  %vm394_vm7 = vcmp.lt.s32.totalorder %v392_v32, 16  ;;  %v399_v41 = vrot.slane %v392_v32, %v1340_v22  ;;  %v427_v15 = vsel %vm420_vm5, 1, %v1099_v37 }
  0x6c   : > { %861 = vmatpush3.msra.mxu0 %v374_v26  ;;  %877 = vmatpush3.msra.mxu1 %v374_v26  ;;  %vm395_vm8 = vmand %vm393_vm6, %vm394_vm7  ;;  %vm444_vm9 = vcmp.ge.s32.totalorder %v443_v39, 0  ;;  %vm445_vm10 = vcmp.lt.s32.totalorder %v443_v39, 16  ;;  %v450_v43 = vrot.slane %v443_v39, %v1340_v22  ;;  %vm426_vm11 = vcmp.eq.s32.totalorder %v1253_v21, %v1348_v33 }
  0x6d   : > { %863 = vmatmul.mubr.msk.f32.vlgmr.msra.gmra.mxu0 %vm505_vm0, %v496_v30  ;;  %869 = vmatmul.mubr.msk.f32.vlgmr.msra.gmra.mxu1 %vm505_vm0, %v500_v31  ;;  %v402_v46 = vsel %vm395_vm8, 1, %v1099_v37  ;;  %v431_v47 = vrot.slane %v427_v15, %v1340_v22  ;;  %vm446_vm12 = vmand %vm444_vm9, %vm445_vm10  ;;  %vm470_vm14 = vcmp.ge.s32.totalorder %v469_v40, 0  ;;  %vm401_vm15 = vcmp.eq.s32.totalorder %v1253_v21, %v399_v41 }
  0x6e   : > { %865 = vmatprep.mubr.msk.f32.mxu0 %vm505_vm0, %v497_v34  ;;  %871 = vmatprep.mubr.msk.f32.mxu1 %vm505_vm0, %v501_v35  ;;  %v406_v48 = vrot.slane %v402_v46, %v1340_v22  ;;  %v453_v49 = vsel %vm446_vm12, 1, %v1099_v37  ;;  %vm471_vm1 = vcmp.lt.s32.totalorder %v469_v40, 16  ;;  %vm452_vm13 = vcmp.eq.s32.totalorder %v1253_v21, %v450_v43 }
  0x6f   : > { %vm1376_vm2 = vcmp.eq.s32.totalorder %v431_v47, 1  ;;  %v457_v51 = vrot.slane %v453_v49, %v1340_v22  ;;  %vm472_vm3 = vmand %vm470_vm14, %vm471_vm1  ;;  %v476_v52 = vrot.slane %v469_v40, %v1340_v22  ;;  %vm425_vm12 = vcmp.eq.s32.totalorder %v1247_v11, %v1348_v33 }
  0x70   : > { %vm1385_vm4 = vcmp.eq.s32.totalorder %v406_v48, 1  ;;  %vm434_vm5 = vmand %vm426_vm11, %vm1376_vm2  ;;  %v479_v54 = vsel %vm472_vm3, 1, %v1099_v37  ;;  %vm400_vm11 = vcmp.eq.s32.totalorder %v1247_v11, %v399_v41  ;;  %vm451_vm1 = vcmp.eq.s32.totalorder %v1247_v11, %v450_v43 }
  0x71   : > { %866 = vmatmul.mubr.msk.f32.gmra.mxu0 %vm505_vm0, %v498_v44  ;;  %872 = vmatmul.mubr.msk.f32.gmra.mxu1 %vm505_vm0, %v502_v45  ;;  %vm409_vm6 = vmand %vm401_vm15, %vm1385_vm4  ;;  %v440_v56 = vsel %vm434_vm5, %v1357_v38, 0.0  ;;  %vm1401_vm0 = vcmp.eq.s32.totalorder %v457_v51, 1  ;;  %vm478_vm7 = vcmp.eq.s32.totalorder %v1253_v21, %v476_v52  ;;  %v483_v58 = vrot.slane %v479_v54, %v1340_v22  ;;  %v635_v54 = vld [vmem:[#allocation2] sm:$0xf] }
  0x72   : > { %v415_v59 = vsel %vm409_vm6, %v1354_v36, 0.0  ;;  %vm460_vm8 = vmand %vm452_vm13, %vm1401_vm0  ;;  %vm477_vm3 = vcmp.eq.s32.totalorder %v1247_v11, %v476_v52  ;;  %vm680_vm6 = vcmask 1043459  }
  0x73   : > { %v442_v37 = vadd.f32 %v440_v56, %v415_v59  ;;  %v466_v60 = vsel %vm460_vm8, %v464_v42, 0.0  ;;  %vm1412_vm9 = vcmp.eq.s32.totalorder %v483_v58, 1  ;;  %vm408_vm14 = vmand %vm400_vm11, %vm1385_vm4  ;;  %vm678_vm4 = vcmask 1042434  }
  0x74   : > { %vm486_vm10 = vmand %vm478_vm7, %vm1412_vm9  ;;  %v414_v21 = vsel %vm408_vm14, %v1354_v36, 0.0 }
  0x75   : > { %v468_v62 = vadd.f32 %v466_v60, %v442_v37  ;;  %v492_v63 = vsel %vm486_vm10, %v490_v55, 0.0  ;;  %vm433_vm15 = vmand %vm425_vm12, %vm1376_vm2  ;;  %vm676_vm2 = vcmask 1041409  }
  0x76   : > { %v439_v1 = vsel %vm433_vm15, %v1357_v38, 0.0  ;;  %vm459_vm13 = vmand %vm451_vm1, %vm1401_vm0 }
  0x77   : > { %v494_v0 = vadd.f32 %v492_v63, %v468_v62  ;;  %v441_v2 = vadd.f32 %v439_v1, %v414_v21  ;;  %v465_v3 = vsel %vm459_vm13, %v464_v42, 0.0  ;;  %vm485_vm5 = vmand %vm477_vm3, %vm1412_vm9 }
  0x78   : > { %v491_v5 = vsel %vm485_vm5, %v490_v55, 0.0 }
  0x79   : > { %v467_v4 = vadd.f32 %v465_v3, %v441_v2 }
  0x7b   : > { %v493_v6 = vadd.f32 %v491_v5, %v467_v4 }
 0x12d   : > { %v864_v8 = vpop.f32.mrf.mxu0  ;;  %v870_v9 = vpop.f32.mrf.mxu1 }
 0x12e   : > { %v641_v10 = vmul.f32 %v870_v9, %v494_v0  ;;  %v637_v14 = vmul.f32 %v864_v8, %v494_v0 }
 0x12f   : > { %v596_v12 = vpop.f32.mrf.mxu0  ;;  %v616_v13 = vpop.f32.mrf.mxu1 }
 0x130   : > { %v636_v16 = vmul.f32 %v596_v12, %v493_v6  ;;  %v640_v17 = vmul.f32 %v616_v13, %v493_v6 }
 0x131   : > { %v867_v18 = vpop.f32.mrf.mxu0  ;;  %v873_v19 = vpop.f32.mrf.mxu1 }
 0x132   : > { %v644_v20 = vadd.f32 %v637_v14, %v636_v16  ;;  %v658_v11 = vadd.f32 %v641_v10, %v640_v17  ;;  %v643_v22 = vmul.f32 %v873_v19, %v494_v0  ;;  %v639_v23 = vmul.f32 %v867_v18, %v494_v0 }
 0x133   : > { %v606_v24 = vpop.f32.mrf.mxu0  ;;  %v626_v25 = vpop.f32.mrf.mxu1 }
 0x134   : > { %v645_v26 = vrot.slane %v644_v20, 4  ;;  %v659_v27 = vrot.slane %v658_v11, 4  ;;  %v638_v28 = vmul.f32 %v606_v24, %v493_v6  ;;  %v642_v29 = vmul.f32 %v626_v25, %v493_v6 }
 0x136   : > { %v646_v30 = vadd.f32 %v645_v26, %v644_v20  ;;  %v660_v31 = vadd.f32 %v659_v27, %v658_v11  ;;  %v651_v32 = vadd.f32 %v639_v23, %v638_v28  ;;  %v665_v33 = vadd.f32 %v643_v22, %v642_v29 }
 0x138   : > { %v647_v34 = vrot.slane %v646_v30, 2  ;;  %v661_v35 = vrot.slane %v660_v31, 2  ;;  %v652_v36 = vrot.slane %v651_v32, 4  ;;  %v666_v38 = vrot.slane %v665_v33, 4 }
 0x13a   : > { %v648_v39 = vadd.f32 %v647_v34, %v646_v30  ;;  %v653_v40 = vadd.f32 %v652_v36, %v651_v32  ;;  %v667_v41 = vadd.f32 %v666_v38, %v665_v33  ;;  %v662_v42 = vadd.f32 %v661_v35, %v660_v31 }
 0x13c   : > { %v654_v15 = vrot.slane %v653_v40, 2  ;;  %v668_v43 = vrot.slane %v667_v41, 2  ;;  %v649_v44 = vrot.slane %v648_v39, 1  ;;  %v663_v47 = vrot.slane %v662_v42, 1 }
 0x13e   : > { %v655_v45 = vadd.f32 %v654_v15, %v653_v40  ;;  %v669_v46 = vadd.f32 %v668_v43, %v667_v41  ;;  %v650_v50 = vadd.f32 %v649_v44, %v648_v39  ;;  %v664_v52 = vadd.f32 %v663_v47, %v662_v42 }
 0x140   : > { %v656_v48 = vrot.slane %v655_v45, 1  ;;  %v670_v49 = vrot.slane %v669_v46, 1 }
 0x142   : > { %v657_v51 = vadd.f32 %v656_v48, %v655_v45  ;;  %v671_v55 = vadd.f32 %v670_v49, %v669_v46 }
 0x144   : > { %v677_v53 = vsel %vm676_vm2, %v657_v51, %v650_v50 }
 0x145   : > { %v679_v56 = vsel %vm678_vm4, %v664_v52, %v677_v53 }
 0x146   : > { %v681_v57 = vsel %vm680_vm6, %v671_v55, %v679_v56 }
 0x147   : > { %v683_v58 = vadd.f32 %v681_v57, %v635_v54 }
 0x149   : > { %684 = vst [vmem:[#allocation2] sm:$0xf] %v683_v58 }
 0x150   : > { %v688_v59 = vld [vmem:[#allocation2] sm:$0xf] }
 0x151   : > { %689 = vst [vmem:[%s226_s29] sm:$0xf] %v688_v59 }
 0x152   : > { %1022 = shalt.err (!%p1019_p6)
}
 0x153   : > { %s1023_s19 = scalar_lea.hbm %s1438_s30, 64  ;;  %s1027_s26 = scalar_lea.hbm %s1482_s2, 128 }
 0x154   : > { %p1024_p7 = scmp.ne.s32.totalorder %s1438_s30, %s1023_s19  ;;  %p1028_p4 = scmp.lt.s32.totalorder %s1438_s30, %s1482_s2 }
 0x155   : > { %p1029_p10 = scmp.lt.s32.totalorder %s1027_s26, %s1023_s19 }
 0x156   : > { %p1025_p1 = pnand %p1024_p7, %p1168_p9 }
 0x157   : > { %p1030_p8 = por %p1029_p10, %p1028_p4 }
 0x158   : > { %p1026_p2 = pneg %p1025_p1 }
 0x15a   : > { %p1031_p0 = pnand %p1030_p8, %p1026_p2 }
 0x15c   : > { %1034 = shalt.err (!%p1031_p0)
}
 0x15d   : > { %886 = dma.vmem_to_hbm [thread:$0]  (%p1168_p9), %s706_s3, 64, %s1438_s30, %s691_s4  }
 0x15e PF: > { %s717_s27 = sand.u32 1, %s1073_s9   ;;  %p1511_p3 = scmp.ge.s32.totalorder %s1093_s14, 2 }
 0x15f   : > { %s718_s21 = scalar_lea.sflag [#allocation7], %s717_s27 }
 0x160   : > { %p896_p13 = pnand %p1511_p3, %p1175_p11 }
 0x162   : > { %p897_p5 = pneg %p896_p13 }
 0x164   : > { %1068 = dma.done.wait (%p897_p5), %s718_s21, 64  }
 0x165   : > { %1070 = vsyncadd (%p897_p5), %s718_s21, 4294967232  ;;  %s21_s14 = sadd.s32 1, %s1093_s14   ;;  %s1512_s9 = smov %s1077_s10 }
 0x166   : > { %p18_p12 = scmp.ge.s32.totalorder %s21_s14, 4   ;;  %s1513_s10 = smov %s1081_s11 }
 0x167   : > { %s1514_s11 = smov %s1173_s23  ;;  %s1515_s12 = smov %s1089_s13 }
 0x168   : > { %s1516_s13 = smov %s1518_s17  ;;  %20 = sbr.rel (!%p18_p12) target bundleno = 8 (0x8), region = 94 }
 0x16d   :  { %723 = vsyncpa [#allocation6], 1 }
 0x16e   :  { %725 = vsyncpa [#allocation6 + $0x1], 1 }
 0x16f   :  { %726 = vsyncpa [#allocation9], 1 }
 0x170   :  { %728 = vsyncpa [#allocation9 + $0x1], 1 }
 0x171   :  { %729 = vsyncpa [#allocation7], 1 }
 0x172   :  { %731 = vsyncpa [#allocation7 + $0x1], 1 }

</bundles_post_ra>
